<compile_context>
chip_gen: v6e
topology: v6e:2x2x1
jax: 0.10.0
libtpu: 0.0.40
codegen_flags: <defaults>
</compile_context>

<pallas_src>
import functools

import jax
import jax.numpy as jnp
from jax.experimental import pallas as pl
from jax.experimental.pallas import tpu as pltpu

VOCAB = 512           # synthesized token-embedding vocabulary
HIDDEN = 768          # BERT sentence-embedding width
TRANSFORM_DIM = 128   # ST Dense module output width
BATCH = 8
SEQ = 8


def _st_embed_kernel(pool_ref, invc_ref, table_ref, w_ref, b_ref, o_ref,
                     acc_ref):
    # pool_ref  : [TB, VK] bf16  masked one-hot counts (exact integers)
    # invc_ref  : [TB, 1]  f32   1 / clamp(sum(mask), 1e-9)
    # table_ref : [VK, H]  bf16  token embedding table slab
    # w_ref     : [H,  T]  bf16  Dense weight (transposed vs. PyTorch)
    # b_ref     : [1,  T]  f32   Dense bias
    # o_ref     : [TB, T]  f32   L2-normalized sentence embeddings
    # acc_ref   : [TB, H]  f32   pooled-sum accumulator (scratch)
    k = pl.program_id(1)

    @pl.when(k == 0)
    def _():
        acc_ref[...] = jnp.zeros_like(acc_ref)

    # Fused gather + masked-sum pooling: counts @ table on the MXU, f32 acc.
    acc_ref[...] += jnp.dot(pool_ref[...], table_ref[...],
                            preferred_element_type=jnp.float32)

    @pl.when(k == pl.num_programs(1) - 1)
    def _():
        # Mean pooling: apply 1/count in f32 only after the exact count-sum.
        pooled = acc_ref[...] * invc_ref[...]                       # [TB, H]
        # nn.Linear(HIDDEN, TRANSFORM_DIM): bf16 MXU operands, f32 accumulate.
        y = jnp.dot(pooled.astype(w_ref.dtype), w_ref[...],
                    preferred_element_type=jnp.float32) + b_ref[...]  # [TB, T]
        # F.normalize(y, p=2, dim=1, eps=1e-12) — exact rsqrt on the EUP.
        sumsq = jnp.sum(y * y, axis=1, keepdims=True)
        o_ref[...] = y * jax.lax.rsqrt(jnp.maximum(sumsq, 1e-24))


def _pick_batch_tile(batch):
    rnd8 = lambda x: -(-x // 8) * 8
    if batch >= 16:
        # >= 2 batch tiles: enables v7x megacore sharding + DMA/compute overlap.
        return min(64, rnd8(-(-batch // 2)))
    return rnd8(batch)


def _pick_vocab_tile(vocab):
    # Keep only a (vk, H) slab of the table in VMEM at a time so the design
    # scales to real (~30K-entry) vocabularies on v7x's 64 MiB VMEM.
    vk = vocab if vocab <= 2048 else 2048
    return vk if vocab % vk == 0 else vocab


@functools.partial(jax.jit, static_argnames=("tb", "vk"))
def _st_sentence_embedding(input_ids, attention_mask, tok_table, w, b, *,
                           tb, vk):
    B, S = input_ids.shape
    V, H = tok_table.shape
    T = w.shape[1]

    # --- XLA-side plumbing (tiny, layout-only) ------------------------------
    mask = attention_mask.astype(jnp.float32)                       # [B, S]
    inv_cnt = 1.0 / jnp.maximum(jnp.sum(mask, axis=1, keepdims=True), 1e-9)
    # Scatter-add pooling matrix: pool[b, v] = sum_s mask[b, s] * (ids==v).
    # Entries are small integer counts -> exact in bf16 (inv_cnt deferred).
    pool = jnp.zeros((B, V), jnp.float32)
    pool = pool.at[jnp.arange(B)[:, None], input_ids.astype(jnp.int32)].add(mask)
    pool = pool.astype(jnp.bfloat16)                                # [B, V]

    # Pad batch to a multiple of the batch tile (padded rows: zero counts and
    # zero inv_cnt -> finite garbage, sliced off below).
    pad = (-B) % tb
    if pad:
        pool = jnp.pad(pool, ((0, pad), (0, 0)))
        inv_cnt = jnp.pad(inv_cnt, ((0, pad), (0, 0)))
    bp = B + pad

    out = pl.pallas_call(
        _st_embed_kernel,
        out_shape=jax.ShapeDtypeStruct((bp, T), jnp.float32),
        grid=(bp // tb, V // vk),                 # batch parallel, vocab reduce
        in_specs=[
            pl.BlockSpec((tb, vk), lambda i, k: (i, k)),   # pooling counts
            pl.BlockSpec((tb, 1), lambda i, k: (i, 0)),    # 1/count
            pl.BlockSpec((vk, H), lambda i, k: (k, 0)),    # table slab
            pl.BlockSpec((H, T), lambda i, k: (0, 0)),     # Dense W (resident)
            pl.BlockSpec((1, T), lambda i, k: (0, 0)),     # Dense b (resident)
        ],
        out_specs=pl.BlockSpec((tb, T), lambda i, k: (i, 0)),
        scratch_shapes=[pltpu.VMEM((tb, H), jnp.float32)],
        compiler_params=pltpu.CompilerParams(
            dimension_semantics=("parallel", "arbitrary")),
        # VMEM footprint at these shapes (bf16 table 768 KiB + bf16 W 192 KiB
        # + small tiles, double-buffered) is ~2 MiB — well under the default
        # scoped-VMEM limit on v5e/v6e/v7x, so no vmem_limit_bytes override.
    )(pool, inv_cnt, tok_table, w, b)

    return out[:B]


class CustomSTEmbeddingPallas:
    """JAX/Pallas re-implementation of CustomSTEmbedding.forward."""

    def __init__(self, key, vocab_size=VOCAB, hidden=HIDDEN,
                 transform_dim=TRANSFORM_DIM):
        k1, k2, k3 = jax.random.split(key, 3)
        # TODO(synk): the real module wraps an external sentence-transformers
        # BERT; it is synthesized here as an embedding table + masked mean
        # pooling + Dense + Normalize module stack.
        bound = 1.0 / (hidden ** 0.5)
        # bf16 storage halves HBM/DMA bytes; matmuls accumulate in f32.
        # (If strict parity with an f32 checkpoint is needed, store f32.)
        self.tok_table = (jax.random.normal(k1, (vocab_size, hidden),
                                            jnp.float32) * 0.02
                          ).astype(jnp.bfloat16)
        self.w = jax.random.uniform(k2, (hidden, transform_dim), jnp.float32,
                                    -bound, bound).astype(jnp.bfloat16)
        self.b = jax.random.uniform(k3, (1, transform_dim), jnp.float32,
                                    -bound, bound)

    def forward(self, input_ids, attention_mask):
        B = input_ids.shape[0]
        tb = _pick_batch_tile(B)
        vk = _pick_vocab_tile(self.tok_table.shape[0])
        # TODO(synk): for repeated calls at tiny B the weight DMA + launch
        # overhead dominates; a cross-pallas_call weight-prefetch future (P10)
        # would hide it but is out of scope for this self-contained script.
        return _st_sentence_embedding(input_ids, attention_mask,
                                      self.tok_table, self.w, self.b,
                                      tb=tb, vk=vk)


if __name__ == "__main__":
    key = jax.random.PRNGKey(0)
    k_model, k_ids, k_len = jax.random.split(key, 3)

    model = CustomSTEmbeddingPallas(k_model)

    input_ids = jax.random.randint(k_ids, (BATCH, SEQ), 0, VOCAB, jnp.int32)
    pos = jnp.arange(SEQ)[None, :]
    lens = jax.random.randint(k_len, (BATCH, 1), 2, SEQ + 1)
    attention_mask = (pos < lens).astype(jnp.int32)

    emb = model.forward(input_ids, attention_mask)
    jax.block_until_ready(emb)

    # Pure-JAX reference (f32 math, bf16 weights upcast) for a sanity check.
    tbl_f32 = model.tok_table.astype(jnp.float32)
    w_f32 = model.w.astype(jnp.float32)
    tok = jnp.take(tbl_f32, input_ids, axis=0)                      # [B, S, H]
    m = attention_mask.astype(jnp.float32)
    pooled = (jnp.sum(tok * m[:, :, None], axis=1)
              / jnp.maximum(jnp.sum(m, axis=1, keepdims=True), 1e-9))
    y = pooled @ w_f32 + model.b
    ref = y / jnp.maximum(jnp.linalg.norm(y, axis=1, keepdims=True), 1e-12)

    assert emb.shape == (BATCH, TRANSFORM_DIM)
    assert bool(jnp.allclose(jnp.linalg.norm(emb, axis=1), 1.0, atol=1e-4))
    assert bool(jnp.max(jnp.abs(emb - ref)) < 2e-2)

    print("KERNEL_OK")
</pallas_src>

<mosaic_0001>
module attributes {stable_mosaic.version = 11 : i64} {
  func.func private @main(%arg0: i32) attributes {dimension_semantics = [#tpu.dimension_semantics<core_parallel>], iteration_bounds = array<i64: 2>, tpu.core_type = #tpu.core_type<sc_scalar_subcore>, window_params = []} {
    return
  }
}

module attributes {stable_mosaic.version = 11 : i64} {
  func.func private @main(%arg0: i32) attributes {dimension_semantics = [#tpu.dimension_semantics<core_parallel>], iteration_bounds = array<i64: 2>, tpu.core_type = #tpu.core_type<sc_scalar_subcore>, window_params = []} {
    return
  }
}

module attributes {stable_mosaic.version = 11 : i64} {
  func.func @_st_embed_kernel(%arg0: i32, %arg1: i32, %arg2: memref<8x512xbf16, #tpu.memory_space<vmem>>, %arg3: memref<8x1xf32, #tpu.memory_space<vmem>>, %arg4: memref<512x768xbf16, #tpu.memory_space<vmem>>, %arg5: memref<768x128xbf16, #tpu.memory_space<vmem>>, %arg6: memref<1x128xf32, #tpu.memory_space<vmem>>, %arg7: memref<8x128xf32, #tpu.memory_space<vmem>>, %arg8: memref<8x768xf32, #tpu.memory_space<vmem>>) attributes {dimension_semantics = [#tpu.dimension_semantics<parallel>, #tpu.dimension_semantics<arbitrary>], iteration_bounds = array<i64: 1, 1>, scalar_prefetch = 0 : i64, scratch_operands = 1 : i64, tpu.core_type = #tpu.core_type<tc>, window_params = [{transform_indices = @transform_0, window_bounds = array<i64: 8, 512>}, {transform_indices = @transform_1, window_bounds = array<i64: 8, 1>}, {transform_indices = @transform_2, window_bounds = array<i64: 512, 768>}, {pipeline_mode = #tpu.pipeline_mode<synchronous>, transform_indices = @transform_3, window_bounds = array<i64: 768, 128>}, {pipeline_mode = #tpu.pipeline_mode<synchronous>, transform_indices = @transform_4, window_bounds = array<i64: 1, 128>}, {transform_indices = @transform_5, window_bounds = array<i64: 8, 128>}]} {
    %c0_i32 = arith.constant 0 : i32
    %0 = arith.cmpi eq, %arg1, %c0_i32 : i32
    %1 = arith.extui %0 : i1 to i32
    %c0_i32_0 = arith.constant 0 : i32
    %2 = arith.cmpi ne, %1, %c0_i32_0 : i32
    scf.if %2 {
      %cst_10 = arith.constant 0.000000e+00 : f32
      %12 = vector.broadcast %cst_10 : f32 to vector<8x768xf32>
      %c0_11 = arith.constant 0 : index
      %c0_12 = arith.constant 0 : index
      %13 = vector.load %arg8[%c0_11, %c0_12] : memref<8x768xf32, #tpu.memory_space<vmem>>, vector<8x768xf32>
      tpu.vector_store %arg8[%c0_11, %c0_12], %12 {strides = array<i32>} : memref<8x768xf32, #tpu.memory_space<vmem>>, vector<8x768xf32>,
    } else {
    }
    %c0 = arith.constant 0 : index
    %c0_1 = arith.constant 0 : index
    %3 = vector.load %arg8[%c0, %c0_1] : memref<8x768xf32, #tpu.memory_space<vmem>>, vector<8x768xf32>
    %c0_2 = arith.constant 0 : index
    %c0_3 = arith.constant 0 : index
    %4 = vector.load %arg2[%c0_2, %c0_3] : memref<8x512xbf16, #tpu.memory_space<vmem>>, vector<8x512xbf16>
    %c0_4 = arith.constant 0 : index
    %c0_5 = arith.constant 0 : index
    %5 = vector.load %arg4[%c0_4, %c0_5] : memref<512x768xbf16, #tpu.memory_space<vmem>>, vector<512x768xbf16>
    %cst = arith.constant dense<0.000000e+00> : vector<8x768xf32>
    %6 = tpu.matmul %4, %5, %cst {dimension_numbers = #tpu.dot_dimension_numbers<[1], [0], [0], [1], [0, 0, 1, 1], [], []>} : vector<8x512xbf16>, vector<512x768xbf16>, vector<8x768xf32> -> vector<8x768xf32>
    %7 = arith.addf %3, %6 : vector<8x768xf32>
    %c0_6 = arith.constant 0 : index
    %c0_7 = arith.constant 0 : index
    %8 = vector.load %arg8[%c0_6, %c0_7] : memref<8x768xf32, #tpu.memory_space<vmem>>, vector<8x768xf32>
    tpu.vector_store %arg8[%c0_6, %c0_7], %7 {strides = array<i32>} : memref<8x768xf32, #tpu.memory_space<vmem>>, vector<8x768xf32>,
    %c0_i32_8 = arith.constant 0 : i32
    %9 = arith.cmpi eq, %arg1, %c0_i32_8 : i32
    %10 = arith.extui %9 : i1 to i32
    %c0_i32_9 = arith.constant 0 : i32
    %11 = arith.cmpi ne, %10, %c0_i32_9 : i32
    scf.if %11 {
      %c0_10 = arith.constant 0 : index
      %c0_11 = arith.constant 0 : index
      %12 = vector.load %arg8[%c0_10, %c0_11] : memref<8x768xf32, #tpu.memory_space<vmem>>, vector<8x768xf32>
      %c0_12 = arith.constant 0 : index
      %c0_13 = arith.constant 0 : index
      %13 = vector.load %arg3[%c0_12, %c0_13] : memref<8x1xf32, #tpu.memory_space<vmem>>, vector<8x1xf32>
      %14 = vector.broadcast %13 : vector<8x1xf32> to vector<8x768xf32>
      %15 = arith.mulf %12, %14 : vector<8x768xf32>
      %16 = arith.truncf %15 : vector<8x768xf32> to vector<8x768xbf16>
      %c0_14 = arith.constant 0 : index
      %c0_15 = arith.constant 0 : index
      %17 = vector.load %arg5[%c0_14, %c0_15] : memref<768x128xbf16, #tpu.memory_space<vmem>>, vector<768x128xbf16>
      %cst_16 = arith.constant dense<0.000000e+00> : vector<8x128xf32>
      %18 = tpu.matmul %16, %17, %cst_16 {dimension_numbers = #tpu.dot_dimension_numbers<[1], [0], [0], [1], [0, 0, 1, 1], [], []>} : vector<8x768xbf16>, vector<768x128xbf16>, vector<8x128xf32> -> vector<8x128xf32>
      %c0_17 = arith.constant 0 : index
      %c0_18 = arith.constant 0 : index
      %19 = vector.load %arg6[%c0_17, %c0_18] : memref<1x128xf32, #tpu.memory_space<vmem>>, vector<1x128xf32>
      %20 = vector.broadcast %19 : vector<1x128xf32> to vector<8x128xf32>
      %21 = arith.addf %18, %20 : vector<8x128xf32>
      %22 = arith.mulf %21, %21 : vector<8x128xf32>
      %cst_19 = arith.constant dense<0.000000e+00> : vector<8xf32>
      %23 = vector.multi_reduction <add>, %22, %cst_19 [1] : vector<8x128xf32> to vector<8xf32>
      %24 = vector.shape_cast %23 : vector<8xf32> to vector<8x1xf32>
      %cst_20 = arith.constant 1.000000e-24 : f32
      %25 = vector.broadcast %cst_20 : f32 to vector<8x1xf32>
      %26 = arith.maximumf %24, %25 : vector<8x1xf32>
      %27 = math.rsqrt %26 : vector<8x1xf32>
      %28 = vector.broadcast %27 : vector<8x1xf32> to vector<8x128xf32>
      %29 = arith.mulf %21, %28 : vector<8x128xf32>
      %c0_21 = arith.constant 0 : index
      %c0_22 = arith.constant 0 : index
      %30 = vector.load %arg7[%c0_21, %c0_22] : memref<8x128xf32, #tpu.memory_space<vmem>>, vector<8x128xf32>
      tpu.vector_store %arg7[%c0_21, %c0_22], %29 {strides = array<i32>} : memref<8x128xf32, #tpu.memory_space<vmem>>, vector<8x128xf32>,
    } else {
    }
    return
  }
  func.func @transform_0(%arg0: i32, %arg1: i32) -> (i32, i32) {
    %c0_i32 = arith.constant 0 : i32
    return %arg0, %arg1 : i32, i32
  }
  func.func @transform_1(%arg0: i32, %arg1: i32) -> (i32, i32) {
    %c0_i32 = arith.constant 0 : i32
    %c0_i32_0 = arith.constant 0 : i32
    return %arg0, %c0_i32 : i32, i32
  }
  func.func @transform_2(%arg0: i32, %arg1: i32) -> (i32, i32) {
    %c0_i32 = arith.constant 0 : i32
    %c0_i32_0 = arith.constant 0 : i32
    return %arg1, %c0_i32 : i32, i32
  }
  func.func @transform_3(%arg0: i32, %arg1: i32) -> (i32, i32) {
    %c0_i32 = arith.constant 0 : i32
    %c0_i32_0 = arith.constant 0 : i32
    %c0_i32_1 = arith.constant 0 : i32
    return %c0_i32, %c0_i32_0 : i32, i32
  }
  func.func @transform_4(%arg0: i32, %arg1: i32) -> (i32, i32) {
    %c0_i32 = arith.constant 0 : i32
    %c0_i32_0 = arith.constant 0 : i32
    %c0_i32_1 = arith.constant 0 : i32
    return %c0_i32, %c0_i32_0 : i32, i32
  }
  func.func @transform_5(%arg0: i32, %arg1: i32) -> (i32, i32) {
    %c0_i32 = arith.constant 0 : i32
    %c0_i32_0 = arith.constant 0 : i32
    return %arg0, %c0_i32 : i32, i32
  }
}

</mosaic_0001>

<bundles_post_ra>
// kernel: _st_sentence_embedding.1
= control target key start
LH: loop header
LB: loop body
LE: loop exit
PB: predicated region body
PF: predicated region fallthrough
CT: control target
= control target key end

     0   :  { %v2701_v14 = vmov 0   ;;  %s3496_s0 = inlined_call_operand.vmem [shape: bf16[8,512], index: 0, kind: input, shape index: {}]   ;;  %s3497_s1 = inlined_call_operand.vmem [shape: f32[8,1], index: 1, kind: input, shape index: {}]   ;;  %s3498_s2 = inlined_call_operand.vmem [shape: bf16[512,768], index: 2, kind: input, shape index: {}]   ;;  %s3499_s3 = inlined_call_operand.vmem [shape: bf16[768,128], index: 3, kind: input, shape index: {}]   ;;  %s3500_s4 = inlined_call_operand.vmem [shape: f32[1,128], index: 4, kind: input, shape index: {}]   ;;  %s3501_s5 = inlined_call_operand.hbm [shape: f32[8,128], index: 5, kind: output, shape index: {}]  }
   0x1   :  { %v2337_v0 = vld [vmem:[%s3498_s2 + $0x154] ss:$24 sps:$4 sm:$0xff]   ;;  %v2341_v2 = vld [vmem:[%s3498_s2 + $0x150] ss:$24 sps:$4 sm:$0xff]   ;;  %v2343_v4 = vld [vmem:[%s3498_s2 + $0x124] ss:$24 sps:$4 sm:$0xff]   ;;  %2336 = vset.pattern.permute.xlu0 %v2701_v14 }
   0x2   :  { %v2339_v1 = vld [vmem:[%s3498_s2 + $0x454] ss:$24 sps:$4 sm:$0xff]   ;;  %1206 = vmatprep.subr.bf16.mxu0 %v2337_v0  ;;  %v2342_v3 = vld [vmem:[%s3498_s2 + $0x450] ss:$24 sps:$4 sm:$0xff]   ;;  %v2345_v5 = vld [vmem:[%s3498_s2 + $0x424] ss:$24 sps:$4 sm:$0xff]  }
   0x3   :  { %1247 = vmatprep.subr.bf16.mxu1 %v2339_v1  ;;  %1207 = vmatpush1.bf16.msra.mxu0 %v2341_v2  ;;  %v2347_v6 = vld [vmem:[%s3498_s2 + $0x120] ss:$24 sps:$4 sm:$0xff]   ;;  %v2349_v8 = vld [vmem:[%s3498_s2 + $0xf4] ss:$24 sps:$4 sm:$0xff]   ;;  %v2353_v10 = vld [vmem:[%s3498_s2 + $0xf0] ss:$24 sps:$4 sm:$0xff]  }
   0x4   :  { %1248 = vmatpush1.bf16.msra.mxu1 %v2342_v3  ;;  %1208 = vmatprep.subr.bf16.mxu0 %v2343_v4  ;;  %v2348_v7 = vld [vmem:[%s3498_s2 + $0x420] ss:$24 sps:$4 sm:$0xff]   ;;  %v2351_v9 = vld [vmem:[%s3498_s2 + $0x3f4] ss:$24 sps:$4 sm:$0xff]   ;;  %v2354_v11 = vld [vmem:[%s3498_s2 + $0x3f0] ss:$24 sps:$4 sm:$0xff]  }
   0x5   :  { %1249 = vmatprep.subr.bf16.mxu1 %v2345_v5  ;;  %v2355_v12 = vld [vmem:[%s3498_s2 + $0xc4] ss:$24 sps:$4 sm:$0xff]   ;;  %v2359_v15 = vld [vmem:[%s3498_s2 + $0xc0] ss:$24 sps:$4 sm:$0xff]   ;;  %v2361_v17 = vld [vmem:[%s3498_s2 + $0x94] ss:$24 sps:$4 sm:$0xff]  }
   0x6   :  { %v2357_v13 = vld [vmem:[%s3498_s2 + $0x3c4] ss:$24 sps:$4 sm:$0xff]   ;;  %v2360_v16 = vld [vmem:[%s3498_s2 + $0x3c0] ss:$24 sps:$4 sm:$0xff]   ;;  %v2363_v18 = vld [vmem:[%s3498_s2 + $0x394] ss:$24 sps:$4 sm:$0xff]  }
   0x7   :  { %1209 = vmatpush1.bf16.msra.mxu0 %v2347_v6  ;;  %v2365_v19 = vld [vmem:[%s3498_s2 + $0x90] ss:$24 sps:$4 sm:$0xff]   ;;  %v2367_v21 = vld [vmem:[%s3498_s2 + $0x64] ss:$24 sps:$4 sm:$0xff]   ;;  %v2371_v23 = vld [vmem:[%s3498_s2 + $0x60] ss:$24 sps:$4 sm:$0xff]  }
   0x8   :  { %1250 = vmatpush1.bf16.msra.mxu1 %v2348_v7  ;;  %1210 = vmatprep.subr.bf16.mxu0 %v2349_v8  ;;  %v2366_v20 = vld [vmem:[%s3498_s2 + $0x390] ss:$24 sps:$4 sm:$0xff]   ;;  %v2369_v22 = vld [vmem:[%s3498_s2 + $0x364] ss:$24 sps:$4 sm:$0xff]   ;;  %v2372_v24 = vld [vmem:[%s3498_s2 + $0x360] ss:$24 sps:$4 sm:$0xff]  }
   0x9   :  { %1251 = vmatprep.subr.bf16.mxu1 %v2351_v9  ;;  %v2373_v25 = vld [vmem:[%s3498_s2 + $0x34] ss:$24 sps:$4 sm:$0xff]   ;;  %v2377_v27 = vld [vmem:[%s3498_s2 + $0x30] ss:$24 sps:$4 sm:$0xff]   ;;  %v2379_v29 = vld [vmem:[%s3498_s2 + $0x4] ss:$24 sps:$4 sm:$0xff]  }
   0xa   :  { %v2375_v26 = vld [vmem:[%s3498_s2 + $0x334] ss:$24 sps:$4 sm:$0xff]   ;;  %v2378_v28 = vld [vmem:[%s3498_s2 + $0x330] ss:$24 sps:$4 sm:$0xff]   ;;  %v2381_v30 = vld [vmem:[%s3498_s2 + $0x304] ss:$24 sps:$4 sm:$0xff]  }
   0xb   :  { %1211 = vmatpush1.bf16.msra.mxu0 %v2353_v10  ;;  %v2383_v31 = vld [vmem:[%s3498_s2] ss:$24 sps:$4 sm:$0xff]   ;;  %v2385_v33 = vld [vmem:[%s3498_s2 + $0x2d4] ss:$24 sps:$4 sm:$0xff]   ;;  %v2389_v35 = vld [vmem:[%s3498_s2 + $0x2d0] ss:$24 sps:$4 sm:$0xff]  }
   0xc   :  { %1252 = vmatpush1.bf16.msra.mxu1 %v2354_v11  ;;  %1212 = vmatprep.subr.bf16.mxu0 %v2355_v12  ;;  %v2384_v32 = vld [vmem:[%s3498_s2 + $0x300] ss:$24 sps:$4 sm:$0xff]   ;;  %v2387_v34 = vld [vmem:[%s3498_s2 + $0x5d4] ss:$24 sps:$4 sm:$0xff]   ;;  %v2390_v36 = vld [vmem:[%s3498_s2 + $0x5d0] ss:$24 sps:$4 sm:$0xff]  }
   0xd   :  { %1253 = vmatprep.subr.bf16.mxu1 %v2357_v13  ;;  %v2391_v37 = vld [vmem:[%s3498_s2 + $0x2a4] ss:$24 sps:$4 sm:$0xff]   ;;  %v2395_v39 = vld [vmem:[%s3498_s2 + $0x2a0] ss:$24 sps:$4 sm:$0xff]   ;;  %v2397_v41 = vld [vmem:[%s3498_s2 + $0x274] ss:$24 sps:$4 sm:$0xff]  }
   0xe   :  { %v2393_v38 = vld [vmem:[%s3498_s2 + $0x5a4] ss:$24 sps:$4 sm:$0xff]   ;;  %v2396_v40 = vld [vmem:[%s3498_s2 + $0x5a0] ss:$24 sps:$4 sm:$0xff]   ;;  %v2399_v42 = vld [vmem:[%s3498_s2 + $0x574] ss:$24 sps:$4 sm:$0xff]  }
   0xf   :  { %1213 = vmatpush1.bf16.msra.mxu0 %v2359_v15  ;;  %v2401_v43 = vld [vmem:[%s3498_s2 + $0x270] ss:$24 sps:$4 sm:$0xff]   ;;  %v2403_v45 = vld [vmem:[%s3498_s2 + $0x244] ss:$24 sps:$4 sm:$0xff]   ;;  %v2407_v50 = vld [vmem:[%s3498_s2 + $0x240] ss:$24 sps:$4 sm:$0xff]  }
  0x10   :  { %1254 = vmatpush1.bf16.msra.mxu1 %v2360_v16  ;;  %1214 = vmatprep.subr.bf16.mxu0 %v2361_v17  ;;  %v2402_v44 = vld [vmem:[%s3498_s2 + $0x570] ss:$24 sps:$4 sm:$0xff]   ;;  %v2405_v46 = vld [vmem:[%s3498_s2 + $0x544] ss:$24 sps:$4 sm:$0xff]   ;;  %v2408_v51 = vld [vmem:[%s3498_s2 + $0x540] ss:$24 sps:$4 sm:$0xff]  }
  0x11   :  { %1255 = vmatprep.subr.bf16.mxu1 %v2363_v18  ;;  %v38_v47 = vld [vmem:[%s3496_s0] sm:$0xff]  ;;  %v39_v49 = vld [vmem:[%s3496_s0 + $0x8] sm:$0xff]  ;;  %v2439_v5 = vld [vmem:[%s3498_s2 + $0x15c] ss:$24 sps:$4 sm:$0xff]  }
  0x12   :  { %v2874_v48 = vcombine.high %v38_v47, %v38_v47  ;;  %v2885_v52 = vcombine.high %v39_v49, %v39_v49  ;;  %v2409_v53 = vld [vmem:[%s3498_s2 + $0x214] ss:$24 sps:$4 sm:$0xff]   ;;  %v2413_v55 = vld [vmem:[%s3498_s2 + $0x210] ss:$24 sps:$4 sm:$0xff]   ;;  %v2415_v57 = vld [vmem:[%s3498_s2 + $0x1e4] ss:$24 sps:$4 sm:$0xff]   ;;  %v2943_v7 = vcombine.low %v38_v47, %v38_v47  ;;  %v2945_v8 = vcombine.low %v39_v49, %v39_v49 }
  0x13   :  { %1215 = vmatpush1.bf16.msra.mxu0 %v2365_v19  ;;  %v2411_v54 = vld [vmem:[%s3498_s2 + $0x514] ss:$24 sps:$4 sm:$0xff]   ;;  %v2414_v56 = vld [vmem:[%s3498_s2 + $0x510] ss:$24 sps:$4 sm:$0xff]   ;;  %v2417_v58 = vld [vmem:[%s3498_s2 + $0x4e4] ss:$24 sps:$4 sm:$0xff]  }
  0x14   :  { %1256 = vmatpush1.bf16.msra.mxu1 %v2366_v20  ;;  %1216 = vmatprep.subr.bf16.mxu0 %v2367_v21  ;;  %v2419_v59 = vld [vmem:[%s3498_s2 + $0x1e0] ss:$24 sps:$4 sm:$0xff]   ;;  %v2421_v61 = vld [vmem:[%s3498_s2 + $0x1b4] ss:$24 sps:$4 sm:$0xff]   ;;  %v2425_v63 = vld [vmem:[%s3498_s2 + $0x1b0] ss:$24 sps:$4 sm:$0xff]  }
  0x15   :  { %1257 = vmatprep.subr.bf16.mxu1 %v2369_v22  ;;  %1238 = vmatprep.mubr.bf16.mxu0 %v2874_v48  ;;  %v2420_v60 = vld [vmem:[%s3498_s2 + $0x4e0] ss:$24 sps:$4 sm:$0xff]   ;;  %v2423_v62 = vld [vmem:[%s3498_s2 + $0x4b4] ss:$24 sps:$4 sm:$0xff]   ;;  %v2426_v0 = vld [vmem:[%s3498_s2 + $0x4b0] ss:$24 sps:$4 sm:$0xff]  }
  0x16   :  { %1279 = vmatprep.mubr.bf16.mxu1 %v2885_v52  ;;  %v2427_v1 = vld [vmem:[%s3498_s2 + $0x184] ss:$24 sps:$4 sm:$0xff]   ;;  %v2431_v3 = vld [vmem:[%s3498_s2 + $0x180] ss:$24 sps:$4 sm:$0xff]  }
  0x17   :  { %1217 = vmatpush1.bf16.msra.mxu0 %v2371_v23  ;;  %v2429_v2 = vld [vmem:[%s3498_s2 + $0x484] ss:$24 sps:$4 sm:$0xff]   ;;  %v2432_v4 = vld [vmem:[%s3498_s2 + $0x480] ss:$24 sps:$4 sm:$0xff]  }
  0x18   :  { %1258 = vmatpush1.bf16.msra.mxu1 %v2372_v24  ;;  %1218 = vmatprep.subr.bf16.mxu0 %v2373_v25  ;;  %v2442_v6 = vld [vmem:[%s3498_s2 + $0x45c] ss:$24 sps:$4 sm:$0xff]   ;;  %v2437_v9 = vld [vmem:[%s3498_s2 + $0x158] ss:$24 sps:$4 sm:$0xff]   ;;  %v2445_v11 = vld [vmem:[%s3498_s2 + $0x12c] ss:$24 sps:$4 sm:$0xff]  }
  0x19   :  { %1259 = vmatprep.subr.bf16.mxu1 %v2375_v26  ;;  %v2440_v10 = vld [vmem:[%s3498_s2 + $0x458] ss:$24 sps:$4 sm:$0xff]   ;;  %v2448_v12 = vld [vmem:[%s3498_s2 + $0x42c] ss:$24 sps:$4 sm:$0xff]   ;;  %v2443_v13 = vld [vmem:[%s3498_s2 + $0x128] ss:$24 sps:$4 sm:$0xff]  }
  0x1a   :  { %v2446_v14 = vld [vmem:[%s3498_s2 + $0x428] ss:$24 sps:$4 sm:$0xff]   ;;  %v2451_v15 = vld [vmem:[%s3498_s2 + $0xfc] ss:$24 sps:$4 sm:$0xff]   ;;  %v2449_v17 = vld [vmem:[%s3498_s2 + $0xf8] ss:$24 sps:$4 sm:$0xff]  }
  0x1b   :  { %1219 = vmatpush1.bf16.msra.mxu0 %v2377_v27  ;;  %v2454_v16 = vld [vmem:[%s3498_s2 + $0x3fc] ss:$24 sps:$4 sm:$0xff]   ;;  %v2452_v18 = vld [vmem:[%s3498_s2 + $0x3f8] ss:$24 sps:$4 sm:$0xff]   ;;  %v2457_v19 = vld [vmem:[%s3498_s2 + $0xcc] ss:$24 sps:$4 sm:$0xff]  }
  0x1c   :  { %1260 = vmatpush1.bf16.msra.mxu1 %v2378_v28  ;;  %1220 = vmatprep.subr.bf16.mxu0 %v2379_v29  ;;  %v2460_v20 = vld [vmem:[%s3498_s2 + $0x3cc] ss:$24 sps:$4 sm:$0xff]   ;;  %v2455_v21 = vld [vmem:[%s3498_s2 + $0xc8] ss:$24 sps:$4 sm:$0xff]   ;;  %v2463_v23 = vld [vmem:[%s3498_s2 + $0x9c] ss:$24 sps:$4 sm:$0xff]  }
  0x1d   :  { %1261 = vmatprep.subr.bf16.mxu1 %v2381_v30  ;;  %v2458_v22 = vld [vmem:[%s3498_s2 + $0x3c8] ss:$24 sps:$4 sm:$0xff]   ;;  %v2466_v24 = vld [vmem:[%s3498_s2 + $0x39c] ss:$24 sps:$4 sm:$0xff]   ;;  %v2461_v25 = vld [vmem:[%s3498_s2 + $0x98] ss:$24 sps:$4 sm:$0xff]  }
  0x1e   :  { %v2464_v26 = vld [vmem:[%s3498_s2 + $0x398] ss:$24 sps:$4 sm:$0xff]   ;;  %v2469_v27 = vld [vmem:[%s3498_s2 + $0x6c] ss:$24 sps:$4 sm:$0xff]   ;;  %v2467_v29 = vld [vmem:[%s3498_s2 + $0x68] ss:$24 sps:$4 sm:$0xff]  }
  0x1f   :  { %1221 = vmatpush1.bf16.msra.mxu0 %v2383_v31  ;;  %v2472_v28 = vld [vmem:[%s3498_s2 + $0x36c] ss:$24 sps:$4 sm:$0xff]   ;;  %v2470_v30 = vld [vmem:[%s3498_s2 + $0x368] ss:$24 sps:$4 sm:$0xff]   ;;  %v2475_v31 = vld [vmem:[%s3498_s2 + $0x3c] ss:$24 sps:$4 sm:$0xff]  }
  0x20   :  { %1262 = vmatpush1.bf16.msra.mxu1 %v2384_v32  ;;  %1222 = vmatprep.subr.bf16.mxu0 %v2385_v33  ;;  %v2478_v32 = vld [vmem:[%s3498_s2 + $0x33c] ss:$24 sps:$4 sm:$0xff]   ;;  %v2473_v33 = vld [vmem:[%s3498_s2 + $0x38] ss:$24 sps:$4 sm:$0xff]   ;;  %v2494_v47 = vld [vmem:[%s3498_s2 + $0x5a8] ss:$24 sps:$4 sm:$0xff]  }
  0x21   :  { %1263 = vmatprep.subr.bf16.mxu1 %v2387_v34  ;;  %v2476_v34 = vld [vmem:[%s3498_s2 + $0x338] ss:$24 sps:$4 sm:$0xff]   ;;  %v2499_v49 = vld [vmem:[%s3498_s2 + $0x27c] ss:$24 sps:$4 sm:$0xff]  }
  0x23   :  { %1223 = vmatpush2.bf16.msra.mxu0 %v2389_v35  ;;  %v2481_v35 = vld [vmem:[%s3498_s2 + $0xc] ss:$24 sps:$4 sm:$0xff]  }
  0x24   :  { %1264 = vmatpush2.bf16.msra.mxu1 %v2390_v36  ;;  %1224 = vmatprep.subr.bf16.mxu0 %v2391_v37  ;;  %v2484_v36 = vld [vmem:[%s3498_s2 + $0x30c] ss:$24 sps:$4 sm:$0xff]   ;;  %v2479_v37 = vld [vmem:[%s3498_s2 + $0x8] ss:$24 sps:$4 sm:$0xff]  }
  0x25   :  { %1265 = vmatprep.subr.bf16.mxu1 %v2393_v38  ;;  %v1473_v38 = vld [vmem:[%s3497_s1] sm:$0xff] }
  0x26   :  { %1476 = vperm.xlu0 %2336, %v1473_v38   ;;  %v2577_v38 = vld [vmem:[%s3498_s2 + $0x14] ss:$24 sps:$4 sm:$0xff]  }
  0x27   :  { %1225 = vmatpush2.bf16.msra.mxu0 %v2395_v39  ;;  %v2482_v39 = vld [vmem:[%s3498_s2 + $0x308] ss:$24 sps:$4 sm:$0xff]  }
  0x28   :  { %1266 = vmatpush2.bf16.msra.mxu1 %v2396_v40  ;;  %1226 = vmatprep.subr.bf16.mxu0 %v2397_v41  ;;  %v2487_v40 = vld [vmem:[%s3498_s2 + $0x2dc] ss:$24 sps:$4 sm:$0xff]  }
  0x29   :  { %1267 = vmatprep.subr.bf16.mxu1 %v2399_v42  ;;  %v2490_v41 = vld [vmem:[%s3498_s2 + $0x5dc] ss:$24 sps:$4 sm:$0xff]   ;;  %v2485_v42 = vld [vmem:[%s3498_s2 + $0x2d8] ss:$24 sps:$4 sm:$0xff]  }
  0x2b   :  { %1227 = vmatpush2.bf16.msra.mxu0 %v2401_v43  ;;  %v2488_v43 = vld [vmem:[%s3498_s2 + $0x5d8] ss:$24 sps:$4 sm:$0xff]  }
  0x2c   :  { %1268 = vmatpush2.bf16.msra.mxu1 %v2402_v44  ;;  %1228 = vmatprep.subr.bf16.mxu0 %v2403_v45  ;;  %v2493_v44 = vld [vmem:[%s3498_s2 + $0x2ac] ss:$24 sps:$4 sm:$0xff]  }
  0x2d   :  { %1269 = vmatprep.subr.bf16.mxu1 %v2405_v46  ;;  %v2496_v45 = vld [vmem:[%s3498_s2 + $0x5ac] ss:$24 sps:$4 sm:$0xff]   ;;  %v2491_v46 = vld [vmem:[%s3498_s2 + $0x2a8] ss:$24 sps:$4 sm:$0xff]  }
  0x2f   :  { %1229 = vmatpush2.bf16.msra.mxu0 %v2407_v50  ;;  %v2502_v50 = vld [vmem:[%s3498_s2 + $0x57c] ss:$24 sps:$4 sm:$0xff]  }
  0x30   :  { %1270 = vmatpush2.bf16.msra.mxu1 %v2408_v51  ;;  %1230 = vmatprep.subr.bf16.mxu0 %v2409_v53  ;;  %v2497_v51 = vld [vmem:[%s3498_s2 + $0x278] ss:$24 sps:$4 sm:$0xff]  }
  0x31   :  { %1271 = vmatprep.subr.bf16.mxu1 %v2411_v54  ;;  %v2500_v53 = vld [vmem:[%s3498_s2 + $0x578] ss:$24 sps:$4 sm:$0xff]   ;;  %v2505_v54 = vld [vmem:[%s3498_s2 + $0x24c] ss:$24 sps:$4 sm:$0xff]  }
  0x33   :  { %1231 = vmatpush2.bf16.msra.mxu0 %v2413_v55  ;;  %v2508_v55 = vld [vmem:[%s3498_s2 + $0x54c] ss:$24 sps:$4 sm:$0xff]  }
  0x34   :  { %1272 = vmatpush2.bf16.msra.mxu1 %v2414_v56  ;;  %1232 = vmatprep.subr.bf16.mxu0 %v2415_v57  ;;  %v2503_v56 = vld [vmem:[%s3498_s2 + $0x248] ss:$24 sps:$4 sm:$0xff]  }
  0x35   :  { %1273 = vmatprep.subr.bf16.mxu1 %v2417_v58  ;;  %v2506_v57 = vld [vmem:[%s3498_s2 + $0x548] ss:$24 sps:$4 sm:$0xff]   ;;  %v2511_v58 = vld [vmem:[%s3498_s2 + $0x21c] ss:$24 sps:$4 sm:$0xff]  }
  0x37   :  { %1233 = vmatpush2.bf16.msra.mxu0 %v2419_v59  ;;  %v2514_v59 = vld [vmem:[%s3498_s2 + $0x51c] ss:$24 sps:$4 sm:$0xff]  }
  0x38   :  { %1274 = vmatpush2.bf16.msra.mxu1 %v2420_v60  ;;  %1234 = vmatprep.subr.bf16.mxu0 %v2421_v61  ;;  %v2509_v60 = vld [vmem:[%s3498_s2 + $0x218] ss:$24 sps:$4 sm:$0xff]  }
  0x39   :  { %1275 = vmatprep.subr.bf16.mxu1 %v2423_v62  ;;  %v2512_v61 = vld [vmem:[%s3498_s2 + $0x518] ss:$24 sps:$4 sm:$0xff]   ;;  %v2517_v62 = vld [vmem:[%s3498_s2 + $0x1ec] ss:$24 sps:$4 sm:$0xff]  }
  0x3b   :  { %1235 = vmatpush2.bf16.msra.mxu0 %v2425_v63  ;;  %v2520_v63 = vld [vmem:[%s3498_s2 + $0x4ec] ss:$24 sps:$4 sm:$0xff]  }
  0x3c   :  { %1276 = vmatpush2.bf16.msra.mxu1 %v2426_v0  ;;  %1236 = vmatprep.subr.bf16.mxu0 %v2427_v1  ;;  %v2515_v0 = vld [vmem:[%s3498_s2 + $0x1e8] ss:$24 sps:$4 sm:$0xff]  }
  0x3d   :  { %1277 = vmatprep.subr.bf16.mxu1 %v2429_v2  ;;  %v2518_v1 = vld [vmem:[%s3498_s2 + $0x4e8] ss:$24 sps:$4 sm:$0xff]   ;;  %v2523_v2 = vld [vmem:[%s3498_s2 + $0x1bc] ss:$24 sps:$4 sm:$0xff]  }
  0x3f   :  { %1237 = vmatpush2.bf16.msra.mxu0 %v2431_v3  ;;  %v2526_v3 = vld [vmem:[%s3498_s2 + $0x4bc] ss:$24 sps:$4 sm:$0xff]  }
  0x40   :  { %1278 = vmatpush2.bf16.msra.mxu1 %v2432_v4  ;;  %1288 = vmatprep.subr.bf16.mxu0 %v2439_v5  ;;  %v2521_v4 = vld [vmem:[%s3498_s2 + $0x1b8] ss:$24 sps:$4 sm:$0xff]  }
  0x41   :  { %1329 = vmatprep.subr.bf16.mxu1 %v2442_v6  ;;  %v2524_v5 = vld [vmem:[%s3498_s2 + $0x4b8] ss:$24 sps:$4 sm:$0xff]   ;;  %v2529_v6 = vld [vmem:[%s3498_s2 + $0x18c] ss:$24 sps:$4 sm:$0xff]  }
  0x42   :  { %1239 = vmatmul.mubr.bf16.vlgmr.msra.gmra.mxu0 %v2943_v7 }
  0x43   :  { %1280 = vmatmul.mubr.bf16.vlgmr.msra.gmra.mxu1 %v2945_v8  ;;  %1289 = vmatpush1.bf16.msra.mxu0 %v2437_v9  ;;  %v2532_v9 = vld [vmem:[%s3498_s2 + $0x48c] ss:$24 sps:$4 sm:$0xff]  }
  0x44   :  { %1330 = vmatpush1.bf16.msra.mxu1 %v2440_v10  ;;  %1290 = vmatprep.subr.bf16.mxu0 %v2445_v11  ;;  %v2527_v10 = vld [vmem:[%s3498_s2 + $0x188] ss:$24 sps:$4 sm:$0xff]  }
  0x45   :  { %1331 = vmatprep.subr.bf16.mxu1 %v2448_v12  ;;  %1320 = vmatprep.mubr.bf16.mxu0 %v2874_v48  ;;  %v2530_v11 = vld [vmem:[%s3498_s2 + $0x488] ss:$24 sps:$4 sm:$0xff]   ;;  %v2535_v12 = vld [vmem:[%s3498_s2 + $0x164] ss:$24 sps:$4 sm:$0xff]  }
  0x46   :  { %1361 = vmatprep.mubr.bf16.mxu1 %v2885_v52 }
  0x47   :  { %1291 = vmatpush1.bf16.msra.mxu0 %v2443_v13  ;;  %v2538_v13 = vld [vmem:[%s3498_s2 + $0x464] ss:$24 sps:$4 sm:$0xff]  }
  0x48   :  { %1332 = vmatpush1.bf16.msra.mxu1 %v2446_v14  ;;  %1292 = vmatprep.subr.bf16.mxu0 %v2451_v15  ;;  %v2533_v14 = vld [vmem:[%s3498_s2 + $0x160] ss:$24 sps:$4 sm:$0xff]  }
  0x49   :  { %1333 = vmatprep.subr.bf16.mxu1 %v2454_v16  ;;  %v2536_v15 = vld [vmem:[%s3498_s2 + $0x460] ss:$24 sps:$4 sm:$0xff]   ;;  %v2541_v16 = vld [vmem:[%s3498_s2 + $0x134] ss:$24 sps:$4 sm:$0xff]  }
  0x4b   :  { %1293 = vmatpush1.bf16.msra.mxu0 %v2449_v17  ;;  %v2544_v17 = vld [vmem:[%s3498_s2 + $0x434] ss:$24 sps:$4 sm:$0xff]  }
  0x4c   :  { %1334 = vmatpush1.bf16.msra.mxu1 %v2452_v18  ;;  %1294 = vmatprep.subr.bf16.mxu0 %v2457_v19  ;;  %v2539_v18 = vld [vmem:[%s3498_s2 + $0x130] ss:$24 sps:$4 sm:$0xff]  }
  0x4d   :  { %1335 = vmatprep.subr.bf16.mxu1 %v2460_v20  ;;  %v2542_v19 = vld [vmem:[%s3498_s2 + $0x430] ss:$24 sps:$4 sm:$0xff]   ;;  %v2547_v20 = vld [vmem:[%s3498_s2 + $0x104] ss:$24 sps:$4 sm:$0xff]  }
  0x4f   :  { %1295 = vmatpush1.bf16.msra.mxu0 %v2455_v21  ;;  %v2550_v21 = vld [vmem:[%s3498_s2 + $0x404] ss:$24 sps:$4 sm:$0xff]  }
  0x50   :  { %1336 = vmatpush1.bf16.msra.mxu1 %v2458_v22  ;;  %1296 = vmatprep.subr.bf16.mxu0 %v2463_v23  ;;  %v2545_v22 = vld [vmem:[%s3498_s2 + $0x100] ss:$24 sps:$4 sm:$0xff]  }
  0x51   :  { %1337 = vmatprep.subr.bf16.mxu1 %v2466_v24  ;;  %v2548_v23 = vld [vmem:[%s3498_s2 + $0x400] ss:$24 sps:$4 sm:$0xff]   ;;  %v2553_v24 = vld [vmem:[%s3498_s2 + $0xd4] ss:$24 sps:$4 sm:$0xff]  }
  0x53   :  { %1297 = vmatpush1.bf16.msra.mxu0 %v2461_v25  ;;  %v2556_v25 = vld [vmem:[%s3498_s2 + $0x3d4] ss:$24 sps:$4 sm:$0xff]  }
  0x54   :  { %1338 = vmatpush1.bf16.msra.mxu1 %v2464_v26  ;;  %1298 = vmatprep.subr.bf16.mxu0 %v2469_v27  ;;  %v2559_v26 = vld [vmem:[%s3498_s2 + $0xa4] ss:$24 sps:$4 sm:$0xff]  }
  0x55   :  { %1339 = vmatprep.subr.bf16.mxu1 %v2472_v28  ;;  %v2562_v27 = vld [vmem:[%s3498_s2 + $0x3a4] ss:$24 sps:$4 sm:$0xff]   ;;  %v2557_v28 = vld [vmem:[%s3498_s2 + $0xa0] ss:$24 sps:$4 sm:$0xff]  }
  0x57   :  { %1299 = vmatpush1.bf16.msra.mxu0 %v2467_v29  ;;  %v2560_v29 = vld [vmem:[%s3498_s2 + $0x3a0] ss:$24 sps:$4 sm:$0xff]  }
  0x58   :  { %1340 = vmatpush1.bf16.msra.mxu1 %v2470_v30  ;;  %1300 = vmatprep.subr.bf16.mxu0 %v2475_v31  ;;  %v2565_v30 = vld [vmem:[%s3498_s2 + $0x74] ss:$24 sps:$4 sm:$0xff]  }
  0x59   :  { %1341 = vmatprep.subr.bf16.mxu1 %v2478_v32  ;;  %v2568_v31 = vld [vmem:[%s3498_s2 + $0x374] ss:$24 sps:$4 sm:$0xff]   ;;  %v2563_v32 = vld [vmem:[%s3498_s2 + $0x70] ss:$24 sps:$4 sm:$0xff]  }
  0x5b   :  { %1301 = vmatpush1.bf16.msra.mxu0 %v2473_v33  ;;  %v2566_v33 = vld [vmem:[%s3498_s2 + $0x370] ss:$24 sps:$4 sm:$0xff]  }
  0x5c   :  { %1342 = vmatpush1.bf16.msra.mxu1 %v2476_v34  ;;  %1302 = vmatprep.subr.bf16.mxu0 %v2481_v35  ;;  %v2571_v34 = vld [vmem:[%s3498_s2 + $0x44] ss:$24 sps:$4 sm:$0xff]  }
  0x5d   :  { %1343 = vmatprep.subr.bf16.mxu1 %v2484_v36  ;;  %v2574_v35 = vld [vmem:[%s3498_s2 + $0x344] ss:$24 sps:$4 sm:$0xff]   ;;  %v2569_v36 = vld [vmem:[%s3498_s2 + $0x40] ss:$24 sps:$4 sm:$0xff]  }
  0x5f   :  { %1303 = vmatpush1.bf16.msra.mxu0 %v2479_v37  ;;  %v2572_v37 = vld [vmem:[%s3498_s2 + $0x340] ss:$24 sps:$4 sm:$0xff]  }
  0x60   :  { %1344 = vmatpush1.bf16.msra.mxu1 %v2482_v39  ;;  %1304 = vmatprep.subr.bf16.mxu0 %v2487_v40  ;;  %v2580_v39 = vld [vmem:[%s3498_s2 + $0x314] ss:$24 sps:$4 sm:$0xff]   ;;  %v2575_v40 = vld [vmem:[%s3498_s2 + $0x10] ss:$24 sps:$4 sm:$0xff]  }
  0x61   :  { %1345 = vmatprep.subr.bf16.mxu1 %v2490_v41  ;;  %v2578_v41 = vld [vmem:[%s3498_s2 + $0x310] ss:$24 sps:$4 sm:$0xff]  }
  0x63   :  { %1305 = vmatpush2.bf16.msra.mxu0 %v2485_v42  ;;  %v2583_v42 = vld [vmem:[%s3498_s2 + $0x2e4] ss:$24 sps:$4 sm:$0xff]  }
  0x64   :  { %1346 = vmatpush2.bf16.msra.mxu1 %v2488_v43  ;;  %1306 = vmatprep.subr.bf16.mxu0 %v2493_v44  ;;  %v2586_v43 = vld [vmem:[%s3498_s2 + $0x5e4] ss:$24 sps:$4 sm:$0xff]   ;;  %v2581_v44 = vld [vmem:[%s3498_s2 + $0x2e0] ss:$24 sps:$4 sm:$0xff]  }
  0x65   :  { %1347 = vmatprep.subr.bf16.mxu1 %v2496_v45  ;;  %v2584_v45 = vld [vmem:[%s3498_s2 + $0x5e0] ss:$24 sps:$4 sm:$0xff]  }
  0x67   :  { %1307 = vmatpush2.bf16.msra.mxu0 %v2491_v46  ;;  %v2589_v46 = vld [vmem:[%s3498_s2 + $0x2b4] ss:$24 sps:$4 sm:$0xff]  }
  0x68   :  { %1348 = vmatpush2.bf16.msra.mxu1 %v2494_v47  ;;  %1308 = vmatprep.subr.bf16.mxu0 %v2499_v49  ;;  %v2592_v47 = vld [vmem:[%s3498_s2 + $0x5b4] ss:$24 sps:$4 sm:$0xff]   ;;  %v2587_v49 = vld [vmem:[%s3498_s2 + $0x2b0] ss:$24 sps:$4 sm:$0xff]  }
  0x69   :  { %1349 = vmatprep.subr.bf16.mxu1 %v2502_v50  ;;  %v2590_v50 = vld [vmem:[%s3498_s2 + $0x5b0] ss:$24 sps:$4 sm:$0xff]  }
  0x6b   :  { %1309 = vmatpush2.bf16.msra.mxu0 %v2497_v51  ;;  %v2595_v51 = vld [vmem:[%s3498_s2 + $0x284] ss:$24 sps:$4 sm:$0xff]  }
  0x6c   :  { %1350 = vmatpush2.bf16.msra.mxu1 %v2500_v53  ;;  %1310 = vmatprep.subr.bf16.mxu0 %v2505_v54  ;;  %v2598_v53 = vld [vmem:[%s3498_s2 + $0x584] ss:$24 sps:$4 sm:$0xff]   ;;  %v2593_v54 = vld [vmem:[%s3498_s2 + $0x280] ss:$24 sps:$4 sm:$0xff]  }
  0x6d   :  { %1351 = vmatprep.subr.bf16.mxu1 %v2508_v55  ;;  %v2596_v55 = vld [vmem:[%s3498_s2 + $0x580] ss:$24 sps:$4 sm:$0xff]  }
  0x6f   :  { %1311 = vmatpush2.bf16.msra.mxu0 %v2503_v56  ;;  %v2601_v56 = vld [vmem:[%s3498_s2 + $0x254] ss:$24 sps:$4 sm:$0xff]  }
  0x70   :  { %1352 = vmatpush2.bf16.msra.mxu1 %v2506_v57  ;;  %1312 = vmatprep.subr.bf16.mxu0 %v2511_v58  ;;  %v2604_v57 = vld [vmem:[%s3498_s2 + $0x554] ss:$24 sps:$4 sm:$0xff]  }
  0x71   :  { %1353 = vmatprep.subr.bf16.mxu1 %v2514_v59 }
  0x73   :  { %1313 = vmatpush2.bf16.msra.mxu0 %v2509_v60 }
  0x74   :  { %1354 = vmatpush2.bf16.msra.mxu1 %v2512_v61  ;;  %1314 = vmatprep.subr.bf16.mxu0 %v2517_v62 }
  0x75   :  { %1355 = vmatprep.subr.bf16.mxu1 %v2520_v63 }
  0x77   :  { %1315 = vmatpush2.bf16.msra.mxu0 %v2515_v0 }
  0x78   :  { %1356 = vmatpush2.bf16.msra.mxu1 %v2518_v1  ;;  %1316 = vmatprep.subr.bf16.mxu0 %v2523_v2 }
  0x79   :  { %1357 = vmatprep.subr.bf16.mxu1 %v2526_v3 }
  0x7b   :  { %1317 = vmatpush2.bf16.msra.mxu0 %v2521_v4 }
  0x7c   :  { %1358 = vmatpush2.bf16.msra.mxu1 %v2524_v5  ;;  %1318 = vmatprep.subr.bf16.mxu0 %v2529_v6 }
  0x7d   :  { %1359 = vmatprep.subr.bf16.mxu1 %v2532_v9 }
  0x7f   :  { %1319 = vmatpush2.bf16.msra.mxu0 %v2527_v10 }
  0x80   :  { %1360 = vmatpush2.bf16.msra.mxu1 %v2530_v11  ;;  %1370 = vmatprep.subr.bf16.mxu0 %v2535_v12 }
  0x81   :  { %1411 = vmatprep.subr.bf16.mxu1 %v2538_v13 }
  0x82   :  { %1321 = vmatmul.mubr.bf16.vlgmr.msra.gmra.mxu0 %v2943_v7 }
  0x83   :  { %1362 = vmatmul.mubr.bf16.vlgmr.msra.gmra.mxu1 %v2945_v8  ;;  %1371 = vmatpush1.bf16.msra.mxu0 %v2533_v14 }
  0x84   :  { %1412 = vmatpush1.bf16.msra.mxu1 %v2536_v15  ;;  %1372 = vmatprep.subr.bf16.mxu0 %v2541_v16 }
  0x85   :  { %1413 = vmatprep.subr.bf16.mxu1 %v2544_v17  ;;  %1402 = vmatprep.mubr.bf16.mxu0 %v2874_v48  ;;  %v2551_v48 = vld [vmem:[%s3498_s2 + $0xd0] ss:$24 sps:$4 sm:$0xff]  }
  0x86   :  { %1443 = vmatprep.mubr.bf16.mxu1 %v2885_v52  ;;  %v2554_v52 = vld [vmem:[%s3498_s2 + $0x3d0] ss:$24 sps:$4 sm:$0xff]  }
  0x87   :  { %1373 = vmatpush1.bf16.msra.mxu0 %v2539_v18 }
  0x88   :  { %1414 = vmatpush1.bf16.msra.mxu1 %v2542_v19  ;;  %1374 = vmatprep.subr.bf16.mxu0 %v2547_v20 }
  0x89   :  { %1415 = vmatprep.subr.bf16.mxu1 %v2550_v21 }
  0x8b   :  { %1375 = vmatpush1.bf16.msra.mxu0 %v2545_v22 }
  0x8c   :  { %1416 = vmatpush1.bf16.msra.mxu1 %v2548_v23  ;;  %1376 = vmatprep.subr.bf16.mxu0 %v2553_v24 }
  0x8d   :  { %1417 = vmatprep.subr.bf16.mxu1 %v2556_v25 }
  0x8f   :  { %1377 = vmatpush1.bf16.msra.mxu0 %v2551_v48 }
  0x90   :  { %1418 = vmatpush1.bf16.msra.mxu1 %v2554_v52  ;;  %1378 = vmatprep.subr.bf16.mxu0 %v2559_v26 }
  0x91   :  { %1419 = vmatprep.subr.bf16.mxu1 %v2562_v27 }
  0x93   :  { %1379 = vmatpush1.bf16.msra.mxu0 %v2557_v28 }
  0x94   :  { %1420 = vmatpush1.bf16.msra.mxu1 %v2560_v29  ;;  %1380 = vmatprep.subr.bf16.mxu0 %v2565_v30 }
  0x95   :  { %1421 = vmatprep.subr.bf16.mxu1 %v2568_v31 }
  0x97   :  { %1381 = vmatpush1.bf16.msra.mxu0 %v2563_v32 }
  0x98   :  { %1422 = vmatpush1.bf16.msra.mxu1 %v2566_v33  ;;  %1382 = vmatprep.subr.bf16.mxu0 %v2571_v34 }
  0x99   :  { %1423 = vmatprep.subr.bf16.mxu1 %v2574_v35 }
  0x9b   :  { %1383 = vmatpush1.bf16.msra.mxu0 %v2569_v36 }
  0x9c   :  { %1424 = vmatpush1.bf16.msra.mxu1 %v2572_v37  ;;  %1384 = vmatprep.subr.bf16.mxu0 %v2577_v38 }
  0x9d   :  { %1425 = vmatprep.subr.bf16.mxu1 %v2580_v39 }
  0x9f   :  { %1385 = vmatpush1.bf16.msra.mxu0 %v2575_v40 }
  0xa0   :  { %1426 = vmatpush1.bf16.msra.mxu1 %v2578_v41  ;;  %1386 = vmatprep.subr.bf16.mxu0 %v2583_v42 }
  0xa1   :  { %1427 = vmatprep.subr.bf16.mxu1 %v2586_v43 }
  0xa3   :  { %1387 = vmatpush2.bf16.msra.mxu0 %v2581_v44 }
  0xa4   :  { %1428 = vmatpush2.bf16.msra.mxu1 %v2584_v45  ;;  %1388 = vmatprep.subr.bf16.mxu0 %v2589_v46 }
  0xa5   :  { %1429 = vmatprep.subr.bf16.mxu1 %v2592_v47 }
  0xa7   :  { %1389 = vmatpush2.bf16.msra.mxu0 %v2587_v49 }
  0xa8   :  { %1430 = vmatpush2.bf16.msra.mxu1 %v2590_v50  ;;  %1390 = vmatprep.subr.bf16.mxu0 %v2595_v51 }
  0xa9   :  { %1431 = vmatprep.subr.bf16.mxu1 %v2598_v53 }
  0xaa   :  { %10 = vsyncpa [#allocation4], 0  ;;  %v2599_v58 = vld [vmem:[%s3498_s2 + $0x250] ss:$24 sps:$4 sm:$0xff]   ;;  %v2607_v60 = vld [vmem:[%s3498_s2 + $0x224] ss:$24 sps:$4 sm:$0xff]   ;;  %v3437_v46 = vpop.permute.xlu0 %1476 }
  0xab   :  { %1391 = vmatpush2.bf16.msra.mxu0 %v2593_v54  ;;  %v2602_v59 = vld [vmem:[%s3498_s2 + $0x550] ss:$24 sps:$4 sm:$0xff]   ;;  %v2610_v61 = vld [vmem:[%s3498_s2 + $0x524] ss:$24 sps:$4 sm:$0xff]   ;;  %v2605_v62 = vld [vmem:[%s3498_s2 + $0x220] ss:$24 sps:$4 sm:$0xff]  }
  0xac   :  { %1432 = vmatpush2.bf16.msra.mxu1 %v2596_v55  ;;  %1392 = vmatprep.subr.bf16.mxu0 %v2601_v56  ;;  %v2608_v63 = vld [vmem:[%s3498_s2 + $0x520] ss:$24 sps:$4 sm:$0xff]   ;;  %v2613_v0 = vld [vmem:[%s3498_s2 + $0x1f4] ss:$24 sps:$4 sm:$0xff]   ;;  %v2611_v2 = vld [vmem:[%s3498_s2 + $0x1f0] ss:$24 sps:$4 sm:$0xff]  }
  0xad   :  { %1433 = vmatprep.subr.bf16.mxu1 %v2604_v57  ;;  %v2616_v1 = vld [vmem:[%s3498_s2 + $0x4f4] ss:$24 sps:$4 sm:$0xff]   ;;  %v2614_v3 = vld [vmem:[%s3498_s2 + $0x4f0] ss:$24 sps:$4 sm:$0xff]   ;;  %v2619_v4 = vld [vmem:[%s3498_s2 + $0x1c4] ss:$24 sps:$4 sm:$0xff]  }
  0xae   :  { %v2622_v5 = vld [vmem:[%s3498_s2 + $0x4c4] ss:$24 sps:$4 sm:$0xff]   ;;  %v2617_v6 = vld [vmem:[%s3498_s2 + $0x1c0] ss:$24 sps:$4 sm:$0xff]   ;;  %v2625_v10 = vld [vmem:[%s3498_s2 + $0x194] ss:$24 sps:$4 sm:$0xff]  }
  0xaf   :  { %1393 = vmatpush2.bf16.msra.mxu0 %v2599_v58  ;;  %v2620_v9 = vld [vmem:[%s3498_s2 + $0x4c0] ss:$24 sps:$4 sm:$0xff]   ;;  %v2628_v11 = vld [vmem:[%s3498_s2 + $0x494] ss:$24 sps:$4 sm:$0xff]   ;;  %v2623_v12 = vld [vmem:[%s3498_s2 + $0x190] ss:$24 sps:$4 sm:$0xff]  }
  0xb0   :  { %1434 = vmatpush2.bf16.msra.mxu1 %v2602_v59  ;;  %1394 = vmatprep.subr.bf16.mxu0 %v2607_v60  ;;  %v2626_v13 = vld [vmem:[%s3498_s2 + $0x490] ss:$24 sps:$4 sm:$0xff]   ;;  %v2629_v14 = vld [vmem:[%s3499_s3 + $0x78] sm:$0xff]   ;;  %v2635_v24 = vld [vmem:[%s3499_s3 + $0x60] sm:$0xff]   ;;  %s2702_s25 = smov [#allocation3]  }
  0xb1   :  { %1435 = vmatprep.subr.bf16.mxu1 %v2610_v61  ;;  %v2645_v15 = vld [vmem:[%s3499_s3 + $0xf8] sm:$0xff]   ;;  %v2631_v18 = vld [vmem:[%s3499_s3 + $0x70] sm:$0xff]   ;;  %v2633_v22 = vld [vmem:[%s3499_s3 + $0x68] sm:$0xff]  }
  0xb2   :  { %v2630_v16 = vld [vmem:[%s3499_s3 + $0x38] sm:$0xff]   ;;  %v2647_v19 = vld [vmem:[%s3499_s3 + $0xf0] sm:$0xff]   ;;  %v2650_v23 = vld [vmem:[%s3499_s3 + $0xa8] sm:$0xff]  }
  0xb3   :  { %1395 = vmatpush2.bf16.msra.mxu0 %v2605_v62  ;;  %v2646_v17 = vld [vmem:[%s3499_s3 + $0xb8] sm:$0xff]   ;;  %v2632_v20 = vld [vmem:[%s3499_s3 + $0x30] sm:$0xff]   ;;  %v2651_v25 = vld [vmem:[%s3499_s3 + $0xe0] sm:$0xff]  }
  0xb4   :  { %1436 = vmatpush2.bf16.msra.mxu1 %v2608_v63  ;;  %1396 = vmatprep.subr.bf16.mxu0 %v2613_v0  ;;  %v2648_v21 = vld [vmem:[%s3499_s3 + $0xb0] sm:$0xff]   ;;  %v2636_v48 = vld [vmem:[%s3499_s3 + $0x20] sm:$0xff]   ;;  %v2637_v26 = vld [vmem:[%s3499_s3 + $0x58] sm:$0xff]  }
  0xb5   :  { %1437 = vmatprep.subr.bf16.mxu1 %v2616_v1  ;;  %v2652_v52 = vld [vmem:[%s3499_s3 + $0xa0] sm:$0xff]   ;;  %v2653_v27 = vld [vmem:[%s3499_s3 + $0xd8] sm:$0xff]   ;;  %v2639_v30 = vld [vmem:[%s3499_s3 + $0x50] sm:$0xff]  }
  0xb6   :  { %v2638_v28 = vld [vmem:[%s3499_s3 + $0x18] sm:$0xff]   ;;  %v2655_v31 = vld [vmem:[%s3499_s3 + $0xd0] sm:$0xff]   ;;  %v2641_v34 = vld [vmem:[%s3499_s3 + $0x48] sm:$0xff]  }
  0xb7   :  { %1397 = vmatpush2.bf16.msra.mxu0 %v2611_v2  ;;  %v2654_v29 = vld [vmem:[%s3499_s3 + $0x98] sm:$0xff]   ;;  %v2640_v32 = vld [vmem:[%s3499_s3 + $0x10] sm:$0xff]   ;;  %v2657_v35 = vld [vmem:[%s3499_s3 + $0xc8] sm:$0xff]  }
  0xb8   :  { %1438 = vmatpush2.bf16.msra.mxu1 %v2614_v3  ;;  %1398 = vmatprep.subr.bf16.mxu0 %v2619_v4  ;;  %v2656_v33 = vld [vmem:[%s3499_s3 + $0x90] sm:$0xff]   ;;  %v2642_v36 = vld [vmem:[%s3499_s3 + $0x8] sm:$0xff]   ;;  %v2643_v38 = vld [vmem:[%s3499_s3 + $0x40] sm:$0xff]  }
  0xb9   :  { %1439 = vmatprep.subr.bf16.mxu1 %v2622_v5  ;;  %v2658_v37 = vld [vmem:[%s3499_s3 + $0x88] sm:$0xff]   ;;  %v2659_v39 = vld [vmem:[%s3499_s3 + $0xc0] sm:$0xff]   ;;  %v2661_v42 = vld [vmem:[%s3499_s3 + $0x178] sm:$0xff]  }
  0xba   :  { %v2644_v40 = vld [vmem:[%s3499_s3] sm:$0xff]   ;;  %v2662_v59 = vld [vmem:[%s3499_s3 + $0x138] sm:$0xff]   ;;  %v2663_v61 = vld [vmem:[%s3499_s3 + $0x170] sm:$0xff]  }
  0xbb   :  { %1399 = vmatpush2.bf16.msra.mxu0 %v2617_v6  ;;  %v2660_v41 = vld [vmem:[%s3499_s3 + $0x80] sm:$0xff]   ;;  %v2664_v62 = vld [vmem:[%s3499_s3 + $0x130] sm:$0xff]   ;;  %v2665_v63 = vld [vmem:[%s3499_s3 + $0x168] sm:$0xff]  }
  0xbc   :  { %1440 = vmatpush2.bf16.msra.mxu1 %v2620_v9  ;;  %1400 = vmatprep.subr.bf16.mxu0 %v2625_v10  ;;  %v2666_v0 = vld [vmem:[%s3499_s3 + $0x128] sm:$0xff]   ;;  %v2667_v1 = vld [vmem:[%s3499_s3 + $0x160] sm:$0xff]   ;;  %v2669_v3 = vld [vmem:[%s3499_s3 + $0x158] sm:$0xff]  }
  0xbd   :  { %1441 = vmatprep.subr.bf16.mxu1 %v2628_v11  ;;  %v2668_v2 = vld [vmem:[%s3499_s3 + $0x120] sm:$0xff]   ;;  %v2670_v4 = vld [vmem:[%s3499_s3 + $0x118] sm:$0xff]   ;;  %v2671_v5 = vld [vmem:[%s3499_s3 + $0x150] sm:$0xff]  }
  0xbe   :  { %v2672_v6 = vld [vmem:[%s3499_s3 + $0x110] sm:$0xff]   ;;  %v2673_v9 = vld [vmem:[%s3499_s3 + $0x148] sm:$0xff]   ;;  %v2675_v11 = vld [vmem:[%s3499_s3 + $0x140] sm:$0xff]  }
  0xbf   :  { %1401 = vmatpush2.bf16.msra.mxu0 %v2623_v12  ;;  %v2674_v10 = vld [vmem:[%s3499_s3 + $0x108] sm:$0xff]   ;;  %v2676_v12 = vld [vmem:[%s3499_s3 + $0x100] sm:$0xff]  }
  0xc0   :  { %1442 = vmatpush2.bf16.msra.mxu1 %v2626_v13  ;;  %2268 = vmatprep.subr.bf16.mxu0 %v2629_v14 }
  0xc1   :  { %2290 = vmatprep.subr.bf16.mxu1 %v2645_v15 }
  0xc2   :  { %1403 = vmatmul.mubr.bf16.vlgmr.msra.gmra.mxu0 %v2943_v7  ;;  %v2649_v7 = vld [vmem:[%s3499_s3 + $0xe8] sm:$0xff]  }
  0xc3   :  { %1444 = vmatmul.mubr.bf16.vlgmr.msra.gmra.mxu1 %v2945_v8  ;;  %2269 = vmatpush3.bf16.msra.mxu0 %v2630_v16  ;;  %v2634_v8 = vld [vmem:[%s3499_s3 + $0x28] sm:$0xff]  }
  0xc4   :  { %2291 = vmatpush3.bf16.msra.mxu1 %v2646_v17  ;;  %2270 = vmatprep.subr.bf16.mxu0 %v2631_v18 }
  0xc5   :  { %2292 = vmatprep.subr.bf16.mxu1 %v2647_v19 }
  0xc7   :  { %2271 = vmatpush3.bf16.msra.mxu0 %v2632_v20 }
  0xc8   :  { %2293 = vmatpush3.bf16.msra.mxu1 %v2648_v21  ;;  %2272 = vmatprep.subr.bf16.mxu0 %v2633_v22 }
  0xc9   :  { %2294 = vmatprep.subr.bf16.mxu1 %v2649_v7 }
  0xcb   :  { %2273 = vmatpush3.bf16.msra.mxu0 %v2634_v8 }
  0xcc   :  { %2295 = vmatpush3.bf16.msra.mxu1 %v2650_v23  ;;  %2274 = vmatprep.subr.bf16.mxu0 %v2635_v24 }
  0xcd   :  { %2296 = vmatprep.subr.bf16.mxu1 %v2651_v25 }
  0xcf   :  { %2275 = vmatpush3.bf16.msra.mxu0 %v2636_v48 }
  0xd0   :  { %2297 = vmatpush3.bf16.msra.mxu1 %v2652_v52  ;;  %2276 = vmatprep.subr.bf16.mxu0 %v2637_v26 }
  0xd1   :  { %2298 = vmatprep.subr.bf16.mxu1 %v2653_v27 }
  0xd3   :  { %2277 = vmatpush3.bf16.msra.mxu0 %v2638_v28 }
  0xd4   :  { %2299 = vmatpush3.bf16.msra.mxu1 %v2654_v29  ;;  %2278 = vmatprep.subr.bf16.mxu0 %v2639_v30 }
  0xd5   :  { %2300 = vmatprep.subr.bf16.mxu1 %v2655_v31 }
  0xd7   :  { %2279 = vmatpush3.bf16.msra.mxu0 %v2640_v32 }
  0xd8   :  { %2301 = vmatpush3.bf16.msra.mxu1 %v2656_v33  ;;  %2280 = vmatprep.subr.bf16.mxu0 %v2641_v34 }
  0xd9   :  { %2302 = vmatprep.subr.bf16.mxu1 %v2657_v35 }
  0xdb   :  { %2281 = vmatpush3.bf16.msra.mxu0 %v2642_v36 }
  0xdc   :  { %2303 = vmatpush3.bf16.msra.mxu1 %v2658_v37  ;;  %2282 = vmatprep.subr.bf16.mxu0 %v2643_v38 }
  0xdd   :  { %2304 = vmatprep.subr.bf16.mxu1 %v2659_v39 }
  0xdf   :  { %2283 = vmatpush3.bf16.msra.mxu0 %v2644_v40 }
  0xe0   :  { %2305 = vmatpush3.bf16.msra.mxu1 %v2660_v41  ;;  %2312 = vmatprep.subr.bf16.mxu0 %v2661_v42  ;;  %v2219_v42 = vld [vmem:[%s3500_s4] ss:$0 sm:$0xff]  ;;  %s2015_s4 = sshll.u32 %s2702_s25, 4  ;;  %s2016_s4 = int_to_ptr.vmem [resolvable:$true] %s2015_s4 }
  0xe1   :  { %s2679_s26 = scalar_lea.vmem %s2016_s4, 128  ;;  %p2684_p1 = scmp.lt.s32.totalorder %s2016_s4, %s2016_s4 }
  0xe2   :  { %p2680_p0 = scmp.ne.s32.totalorder %s2016_s4, %s2679_s26  ;;  %p2685_p2 = scmp.lt.s32.totalorder %s2679_s26, %s2679_s26 }
  0xe4   :  { %p2686_p3 = por %p2685_p2, %p2684_p1 }
  0xe6   :  { %p2687_p4 = pnand %p2686_p3, %p2680_p0 }
 0x102   :  { %v1240_v43 = vpop.f32.mrf.mxu0 }
 0x103   :  { %v1281_v44 = vpop.f32.mrf.mxu1 }
 0x104   :  { %v1282_v45 = vadd.f32 %v1281_v44, %v1240_v43  ;;  %v1242_v47 = vpop.f32.mrf.mxu0 }
 0x105   :  { %v1283_v49 = vpop.f32.mrf.mxu1 }
 0x106   :  { %v1284_v50 = vadd.f32 %v1283_v49, %v1242_v47  ;;  %v1244_v51 = vpop.f32.mrf.mxu0  ;;  %v1479_v54 = vmul.f32 %v3437_v46, %v1282_v45 }
 0x107   :  { %v1285_v53 = vpop.f32.mrf.mxu1 }
 0x108   :  { %v1480_v55 = vmul.f32 %v3437_v46, %v1284_v50  ;;  %v1245_v56 = vpop.f32.mrf.mxu0  ;;  %v1485_v60 = vpack.c.bf16 %v1479_v54, %v1479_v54 }
 0x109   :  { %v1286_v57 = vpop.f32.mrf.mxu1 }
 0x10a   :  { %v1486_v58 = vpack.c.bf16 %v1480_v55, %v1480_v55 }
 0x10c   :  { %1914 = vmatprep.mubr.bf16.mxu0 %v1486_v58 }
 0x10d   :  { %1915 = vmatmul.mubr.bf16.vlgmr.msra.gmra.mxu0 %v1485_v60 }
 0x10e   :  { %2313 = vmatpush3.bf16.msra.mxu0 %v2662_v59 }
 0x10f   :  { %2314 = vmatprep.subr.bf16.mxu0 %v2663_v61 }
 0x112   :  { %2315 = vmatpush3.bf16.msra.mxu0 %v2664_v62 }
 0x113   :  { %2316 = vmatprep.subr.bf16.mxu0 %v2665_v63 }
 0x116   :  { %2317 = vmatpush3.bf16.msra.mxu0 %v2666_v0 }
 0x117   :  { %2318 = vmatprep.subr.bf16.mxu0 %v2667_v1 }
 0x11a   :  { %2319 = vmatpush3.bf16.msra.mxu0 %v2668_v2 }
 0x11b   :  { %2320 = vmatprep.subr.bf16.mxu0 %v2669_v3 }
 0x11e   :  { %2321 = vmatpush3.bf16.msra.mxu0 %v2670_v4 }
 0x11f   :  { %2322 = vmatprep.subr.bf16.mxu0 %v2671_v5 }
 0x122   :  { %2323 = vmatpush3.bf16.msra.mxu0 %v2672_v6 }
 0x123   :  { %2324 = vmatprep.subr.bf16.mxu0 %v2673_v9 }
 0x126   :  { %2325 = vmatpush3.bf16.msra.mxu0 %v2674_v10 }
 0x127   :  { %2326 = vmatprep.subr.bf16.mxu0 %v2675_v11 }
 0x12a   :  { %2327 = vmatpush3.bf16.msra.mxu0 %v2676_v12 }
 0x142   :  { %v1322_v13 = vpop.f32.mrf.mxu0 }
 0x143   :  { %v1363_v14 = vpop.f32.mrf.mxu1 }
 0x144   :  { %v1364_v15 = vadd.f32 %v1363_v14, %v1322_v13  ;;  %v1324_v16 = vpop.f32.mrf.mxu0 }
 0x145   :  { %v1365_v17 = vpop.f32.mrf.mxu1 }
 0x146   :  { %v1366_v18 = vadd.f32 %v1365_v17, %v1324_v16  ;;  %v1481_v19 = vmul.f32 %v3437_v46, %v1364_v15  ;;  %v1326_v20 = vpop.f32.mrf.mxu0 }
 0x147   :  { %v1367_v21 = vpop.f32.mrf.mxu1 }
 0x148   :  { %v1482_v22 = vmul.f32 %v3437_v46, %v1366_v18  ;;  %v1327_v7 = vpop.f32.mrf.mxu0  ;;  %v1487_v24 = vpack.c.bf16 %v1481_v19, %v1481_v19 }
 0x149   :  { %v1368_v8 = vpop.f32.mrf.mxu1 }
 0x14a   :  { %v1488_v23 = vpack.c.bf16 %v1482_v22, %v1482_v22 }
 0x14c   :  { %1954 = vmatprep.mubr.bf16.mxu1 %v1488_v23 }
 0x14d   :  { %1955 = vmatmul.mubr.bf16.vlgmr.msra.gmra.mxu1 %v1487_v24 }
 0x182   :  { %v1404_v25 = vpop.f32.mrf.mxu0 }
 0x183   :  { %v1445_v48 = vpop.f32.mrf.mxu1 }
 0x184   :  { %v1446_v52 = vadd.f32 %v1445_v48, %v1404_v25  ;;  %v1406_v26 = vpop.f32.mrf.mxu0 }
 0x185   :  { %v1447_v27 = vpop.f32.mrf.mxu1 }
 0x186   :  { %v1448_v28 = vadd.f32 %v1447_v27, %v1406_v26  ;;  %v1483_v29 = vmul.f32 %v3437_v46, %v1446_v52  ;;  %v1408_v30 = vpop.f32.mrf.mxu0 }
 0x187   :  { %v1449_v31 = vpop.f32.mrf.mxu1 }
 0x188   :  { %v1484_v32 = vmul.f32 %v3437_v46, %v1448_v28  ;;  %v1409_v33 = vpop.f32.mrf.mxu0  ;;  %v1489_v36 = vpack.c.bf16 %v1483_v29, %v1483_v29 }
 0x189   :  { %v1450_v34 = vpop.f32.mrf.mxu1 }
 0x18a   :  { %v1490_v35 = vpack.c.bf16 %v1484_v32, %v1484_v32 }
 0x18c   :  { %1994 = vmatprep.mubr.bf16.mxu0 %v1490_v35 }
 0x18d   :  { %1995 = vmatmul.mubr.bf16.vlgmr.msra.gmra.mxu0 %v1489_v36 }
 0x1cd   :  { %v2284_v37 = vpop.f32.mrf.mxu0 }
 0x1cf   :  { %v2285_v38 = vpop.f32.mrf.mxu0 }
 0x1d0   :  { %v2286_v39 = vadd.f32 %v2285_v38, %v2284_v37 }
 0x1d1   :  { %v2287_v40 = vpop.f32.mrf.mxu0 }
 0x1d2   :  { %v1917_v45 = vadd.f32 %v2286_v39, %v2219_v42 }
 0x1d3   :  { %v2288_v41 = vpop.f32.mrf.mxu0 }
 0x20d   :  { %v2306_v43 = vpop.f32.mrf.mxu1 }
 0x20f   :  { %v2307_v44 = vpop.f32.mrf.mxu1 }
 0x210   :  { %v2308_v47 = vadd.f32 %v2307_v44, %v2306_v43 }
 0x211   :  { %v2309_v46 = vpop.f32.mrf.mxu1 }
 0x212   :  { %v1957_v49 = vadd.f32 %v2308_v47, %v1917_v45 }
 0x213   :  { %v2310_v50 = vpop.f32.mrf.mxu1 }
 0x24d   :  { %v2328_v51 = vpop.f32.mrf.mxu0 }
 0x24f   :  { %v2329_v53 = vpop.f32.mrf.mxu0 }
 0x250   :  { %v2330_v54 = vadd.f32 %v2329_v53, %v2328_v51 }
 0x251   :  { %v2331_v55 = vpop.f32.mrf.mxu0 }
 0x252   :  { %v1997_v56 = vadd.f32 %v2330_v54, %v1957_v49 }
 0x253   :  { %v2332_v57 = vpop.f32.mrf.mxu0 }
 0x254   :  { %v2002_v58 = vmul.f32 %v1997_v56, %v1997_v56 }
 0x256   :  { %2003 = vadd.xlane.f32.xlu0 %v2002_v58 }
 0x2df   :  { %v2004_v59 = vpop.xlane.xlu0 %2003 }
 0x2e0   :  { %v2005_v60 = vmax.f32 %v2004_v59, 1e-24 }
 0x2e2   :  { %2677 = vrsqrt.f32 %v2005_v60 }
 0x2ef   :  { %v2678_v61 = vpop.eup %2677 }
 0x2f0   :  { %v2007_v62 = vmul.f32 %v2678_v61, %v1997_v56 }
 0x2f2   :  { %2008 = vst [vmem:[#allocation3] sm:$0xff] %v2007_v62 }
 0x2f3   :  { %2690 = shalt.err (!%p2687_p4)
}
 0x2f4   :  { %2018 = dma.vmem_to_hbm [thread:$0]  %s2016_s4, 128, %s3501_s5, [#allocation4]  }
 0x2f5   :  { %2699 = dma.done.wait [#allocation4], 128  }
 0x2f6   :  { %2700 = vsyncadd [#allocation4], 4294967168 }
 0x2f7   :  { %2022 = vsyncpa [#allocation4], 1 }

</bundles_post_ra>
